<compile_context>
chip_gen: v5e
topology: v5e:2x2
jax: 0.10.0
libtpu: 0.0.40
codegen_flags: <defaults>
</compile_context>

<pallas_src>
import functools

import jax
import jax.numpy as jnp
from jax.experimental import pallas as pl
from jax.experimental.pallas import tpu as pltpu

BN_EPS = 1e-5


def _vmem_capacity_bytes():
    try:
        cap = int(pltpu.get_tpu_info().vmem_capacity_bytes)
        if cap > 0:
            return cap
    except Exception:
        pass
    return 64 * 1024 * 1024


_VMEM_CAP = _vmem_capacity_bytes()
# Leave headroom below physical VMEM (review: do not pin the limit at 64 MiB
# on v7x); on 128 MiB parts this is ~108 MiB, on v7x ~54 MiB.
VMEM_LIMIT = max(int(_VMEM_CAP * 0.85), 32 * 1024 * 1024)
SCRATCH_BUDGET = max(int(_VMEM_CAP * 0.55), 24 * 1024 * 1024)


# ----------------------------------------------------------------------------
# Kernel 1: tiled (M, Cin) x (Cin, Cout) matmul + BN affine + ReLU
# ----------------------------------------------------------------------------
def _matmul_bn_relu_kernel(x_ref, w_ref, scale_ref, bias_ref, o_ref):
    acc = jnp.dot(x_ref[...], w_ref[...], preferred_element_type=jnp.float32)
    y = acc * scale_ref[...] + bias_ref[...]
    o_ref[...] = jnp.maximum(y, 0.0).astype(o_ref.dtype)


def matmul_bn_relu(x2d, w, scale, bias, out_dtype=jnp.bfloat16, tm_max=1024):
    """y = relu(bn(x2d @ w)); rows tiled over a 'parallel' cdiv grid.

    No jnp.pad / out[:M] round-trip: a ragged last block is handled by the
    Pallas boundary masking (garbage rows read, OOB writes discarded).
    """
    M, Cin = x2d.shape
    Cout = w.shape[1]
    TM = M if M <= tm_max else tm_max          # full-extent block or /8 tile
    grid_m = pl.cdiv(M, TM)
    return pl.pallas_call(
        _matmul_bn_relu_kernel,
        out_shape=jax.ShapeDtypeStruct((M, Cout), out_dtype),
        grid=(grid_m,),
        in_specs=[
            pl.BlockSpec((TM, Cin), lambda i: (i, 0)),
            pl.BlockSpec((Cin, Cout), lambda i: (0, 0)),
            pl.BlockSpec((1, Cout), lambda i: (0, 0)),
            pl.BlockSpec((1, Cout), lambda i: (0, 0)),
        ],
        out_specs=pl.BlockSpec((TM, Cout), lambda i: (i, 0)),
        compiler_params=pltpu.CompilerParams(
            dimension_semantics=("parallel",),
            vmem_limit_bytes=VMEM_LIMIT),
    )(x2d, w, scale.reshape(1, Cout).astype(jnp.float32),
      bias.reshape(1, Cout).astype(jnp.float32))


# ----------------------------------------------------------------------------
# Kernel 2: fused dilated 3x3 branches (rates 6/12/18), shared halo-slab DMA
# ----------------------------------------------------------------------------
def _fused_dilated_kernel(x_hbm, w_ref, scale_ref, bias_ref,
                          o2_ref, o3_ref, o4_ref, slab, sem, *,
                          rates, max_rate, TH, W, Wp, Cin, P,
                          blocks_per_split, L):
    n = pl.program_id(0)
    sp = pl.program_id(1)
    hb = pl.program_id(2)
    gb = sp * blocks_per_split + hb            # global row block index
    slot = hb & 1

    # One descriptor builder used for BOTH start and wait (kept identical per
    # the review), covering padded rows [row_block*TH, row_block*TH + L).
    def slab_copy(row_block, slot_idx):
        r0 = row_block * TH
        return pltpu.make_async_copy(
            x_hbm.at[n, pl.ds(r0 * Wp, L * Wp)],
            slab.at[slot_idx, pl.ds(0, L * Wp)],
            sem.at[slot_idx])

    @pl.when(hb == 0)
    def _():                                   # prime first block of this range
        slab_copy(gb, slot).start()

    slab_copy(gb, slot).wait()

    @pl.when(hb + 1 < blocks_per_split)
    def _():                                   # prefetch next block of range
        slab_copy(gb + 1, 1 - slot).start()

    out_refs = (o2_ref, o3_ref, o4_ref)
    for br, rate in enumerate(rates):
        off = max_rate - rate                  # offset into shared max-rate pad
        acc = jnp.zeros((TH * Wp, P), jnp.float32)
        for tap in range(9):
            ky, kx = divmod(tap, 3)
            # Contiguous flat window: entry (t*Wp + w) reads padded pixel
            # (t + off + ky*rate, w + off + kx*rate).  Columns w >= W are
            # garbage and are dropped at the store below.
            start = (off + ky * rate) * Wp + (off + kx * rate)
            win = slab[slot, pl.ds(start, TH * Wp), :]        # (TH*Wp, Cin)
            acc = acc + jnp.dot(win, w_ref[br, tap],
                                preferred_element_type=jnp.float32)
        y = acc * scale_ref[br].reshape(1, P) + bias_ref[br].reshape(1, P)
        y = jnp.maximum(y, 0.0)
        # Single small output-sized relayout: drop the pad columns.
        out_refs[br][0] = y.reshape(TH, Wp, P)[:, :W, :].astype(o2_ref.dtype)


def _pick_th(H, W, Wp, Cin, P, max_rate, budget):
    """Largest row tile whose fused-branch scratch fits the VMEM budget while
    minimizing padded rows fetched from HBM per image (halo amortization)."""
    lane = 128
    cin_pad = max(Cin, lane)
    p_pad = max(P, lane)
    h_cap = -(-H // 8) * 8
    best_th, best_cost = 8, None
    for th in (8, 16, 24, 32, 48, 64, 96, 128):
        if th > max(8, h_cap):
            break
        L = th + 2 * max_rate
        slab = 2 * (L + 1) * Wp * cin_pad * 2      # double-buffered bf16 slab
        wts = 2 * 3 * 9 * Cin * p_pad * 2          # 3 branch weight sets (x2)
        outs = 2 * 3 * th * W * p_pad * 2          # 3 bf16 output blocks (x2)
        accs = 2 * th * Wp * p_pad * 4             # live f32 acc + relayout tmp
        if slab + wts + outs + accs > budget:
            continue
        cost = (-(-H // th)) * (th + 2 * max_rate)
        if best_cost is None or cost <= best_cost:
            best_th, best_cost = th, cost
    return best_th


def fused_dilated_branches(x_flat, w_all, scale_all, bias_all, *, rates,
                           max_rate, N, W, Wp, Hpad, TH, Cin, P):
    """x_flat: (N, (Hpad+2*max_rate)*Wp, Cin) bf16 (flattened padded NHWC).

    Returns three (N, Hpad, W, P) bf16 branch outputs.
    """
    assert len(rates) == 3
    n_blocks = Hpad // TH
    # Feed both v7x TensorCores when the batch axis cannot (N == 1).
    n_splits = 2 if (N == 1 and n_blocks % 2 == 0 and n_blocks >= 2) else 1
    bps = n_blocks // n_splits
    L = TH + 2 * max_rate

    kernel = functools.partial(
        _fused_dilated_kernel, rates=tuple(rates), max_rate=max_rate, TH=TH,
        W=W, Wp=Wp, Cin=Cin, P=P, blocks_per_split=bps, L=L)

    out_spec = pl.BlockSpec((1, TH, W, P),
                            lambda n, sp, hb: (n, sp * bps + hb, 0, 0))
    out_shape = tuple(jax.ShapeDtypeStruct((N, Hpad, W, P), jnp.bfloat16)
                      for _ in range(3))
    return pl.pallas_call(
        kernel,
        out_shape=out_shape,
        grid=(N, n_splits, bps),
        in_specs=[
            pl.BlockSpec(memory_space=pl.ANY),     # padded input stays in HBM
            pl.BlockSpec((3, 9, Cin, P), lambda n, sp, hb: (0, 0, 0, 0)),
            pl.BlockSpec((3, P), lambda n, sp, hb: (0, 0)),
            pl.BlockSpec((3, P), lambda n, sp, hb: (0, 0)),
        ],
        out_specs=(out_spec, out_spec, out_spec),
        scratch_shapes=[
            # Flat double-buffered slab; +1 spare row so the contiguous tap
            # windows never index outside the allocation (the spare feeds only
            # garbage columns that are dropped at the store).
            pltpu.VMEM((2, (L + 1) * Wp, Cin), jnp.bfloat16),
            pltpu.SemaphoreType.DMA((2,)),
        ],
        compiler_params=pltpu.CompilerParams(
            # Row-block axis stays 'arbitrary': the slab prefetch chain relies
            # on in-order row blocks; batch and core-split axes are parallel.
            dimension_semantics=("parallel", "parallel", "arbitrary"),
            vmem_limit_bytes=VMEM_LIMIT),
    )(x_flat, w_all, scale_all, bias_all)


# ----------------------------------------------------------------------------
# Kernel 3: fused final projection (concat-free 1x1 conv over 5 branches)
# ----------------------------------------------------------------------------
def _fused_proj_kernel(x1_ref, x2_ref, x3_ref, x4_ref, x5_ref, w_ref,
                       scale_ref, bias_ref, o_ref):
    acc = jnp.dot(x1_ref[0], w_ref[0], preferred_element_type=jnp.float32)
    acc = acc + jnp.dot(x2_ref[0], w_ref[1], preferred_element_type=jnp.float32)
    acc = acc + jnp.dot(x3_ref[0], w_ref[2], preferred_element_type=jnp.float32)
    acc = acc + jnp.dot(x4_ref[0], w_ref[3], preferred_element_type=jnp.float32)
    # Global-average-pool branch: rank-1 contribution broadcast over the tile
    # (bilinear upsample of a 1x1 map == constant; never materialized in HBM).
    acc = acc + jnp.dot(x5_ref[0], w_ref[4], preferred_element_type=jnp.float32)
    y = acc * scale_ref[...] + bias_ref[...]
    o_ref[0] = jnp.maximum(y, 0.0).astype(o_ref.dtype)


def fused_final_projection(x1, x2, x3, x4, x5, w_cat, scale, bias,
                           tm_max=1024):
    """x1..x4: (N, HW, P) bf16, x5: (N, 1, P) bf16, w_cat: (5, P, P) bf16.

    Output is bf16 (review: the kernel is HBM-bound; f32 stores were ~1/3 of
    its traffic).  Fixed-size row tile with a cdiv grid (shape-independent).
    """
    N, HW, P = x1.shape
    TM = HW if HW <= tm_max else tm_max
    grid_m = pl.cdiv(HW, TM)
    xspec = pl.BlockSpec((1, TM, P), lambda n, m: (n, m, 0))
    return pl.pallas_call(
        _fused_proj_kernel,
        out_shape=jax.ShapeDtypeStruct((N, HW, P), jnp.bfloat16),
        grid=(N, grid_m),
        in_specs=[
            xspec, xspec, xspec, xspec,
            pl.BlockSpec((1, 1, P), lambda n, m: (n, 0, 0)),
            pl.BlockSpec((5, P, P), lambda n, m: (0, 0, 0)),
            pl.BlockSpec((1, P), lambda n, m: (0, 0)),
            pl.BlockSpec((1, P), lambda n, m: (0, 0)),
        ],
        out_specs=pl.BlockSpec((1, TM, P), lambda n, m: (n, m, 0)),
        compiler_params=pltpu.CompilerParams(
            dimension_semantics=("parallel", "parallel"),
            vmem_limit_bytes=VMEM_LIMIT),
    )(x1, x2, x3, x4, x5, w_cat,
      scale.reshape(1, P).astype(jnp.float32),
      bias.reshape(1, P).astype(jnp.float32))


# ----------------------------------------------------------------------------
# Parameter construction (deterministic, kaiming_normal like torch init)
# ----------------------------------------------------------------------------
def _kaiming_normal(key, cout, cin, kh, kw):
    fan_in = cin * kh * kw
    std = (2.0 / fan_in) ** 0.5
    return std * jax.random.normal(key, (cout, cin, kh, kw), jnp.float32)


def _bn_affine(cout):
    # gamma=1, beta=0, running_mean=0, running_var=1 (fresh BatchNorm2d, eval)
    scale = jnp.full((cout,), 1.0 / jnp.sqrt(1.0 + BN_EPS), jnp.float32)
    bias = jnp.zeros((cout,), jnp.float32)
    return scale, bias


def make_aspp_params(key, inplanes, planes, rates=(1, 6, 12, 18)):
    keys = jax.random.split(key, 6)
    params = {}
    w = _kaiming_normal(keys[0], planes, inplanes, 1, 1)
    params["w_aspp1"] = jnp.transpose(w[:, :, 0, 0], (1, 0))          # (Cin, P)
    for i, r in enumerate(rates[1:], start=2):
        w = _kaiming_normal(keys[i - 1], planes, inplanes, 3, 3)
        params[f"w_aspp{i}"] = jnp.transpose(w, (2, 3, 1, 0)).reshape(
            9, inplanes, planes)                                      # (9,Cin,P)
    w = _kaiming_normal(keys[4], planes, inplanes, 1, 1)
    params["w_gap"] = jnp.transpose(w[:, :, 0, 0], (1, 0))            # (Cin, P)
    w = _kaiming_normal(keys[5], planes, planes * 5, 1, 1)
    params["w_cat"] = jnp.transpose(w[:, :, 0, 0], (1, 0))            # (5P, P)
    for name in ("bn1", "bn2", "bn3", "bn4", "bn_gap", "bn_cat"):
        s, b = _bn_affine(planes)
        params[f"{name}_scale"], params[f"{name}_bias"] = s, b
    params["rates"] = tuple(rates)
    return params


# ----------------------------------------------------------------------------
# Full ASPP forward (wrapper glue in plain JAX, hot paths in Pallas)
# ----------------------------------------------------------------------------
def aspp_forward(x_nchw, params, th_override=None):
    N, Cin, H, W = x_nchw.shape
    rates = params["rates"]
    dil_rates = tuple(rates[1:])
    max_rate = max(dil_rates)
    P = params["w_aspp1"].shape[1]

    # NCHW -> NHWC + bf16 cast in one fused XLA pass (no f32 NHWC copy).
    xb = jnp.transpose(x_nchw, (0, 2, 3, 1)).astype(jnp.bfloat16)

    # branch 1: 1x1 conv + BN + ReLU (tiled channel matmul)
    x1 = matmul_bn_relu(xb.reshape(N * H * W, Cin),
                        params["w_aspp1"].astype(jnp.bfloat16),
                        params["bn1_scale"], params["bn1_bias"])
    x1 = x1.reshape(N, H * W, P)

    # branches 2-4: fused dilated 3x3 convs, one shared max-rate padded input
    Wp = W + 2 * max_rate
    TH = int(th_override) if th_override else _pick_th(
        H, W, Wp, Cin, P, max_rate, SCRATCH_BUDGET)
    Hpad = (-(-H // TH)) * TH
    x_big = jnp.pad(xb, ((0, 0),
                         (max_rate, max_rate + (Hpad - H)),
                         (max_rate, max_rate), (0, 0)))
    x_big = x_big.reshape(N, (Hpad + 2 * max_rate) * Wp, Cin)  # flat (free)
    w_all = jnp.stack([params["w_aspp2"], params["w_aspp3"],
                       params["w_aspp4"]]).astype(jnp.bfloat16)  # (3,9,Cin,P)
    scale_all = jnp.stack([params["bn2_scale"], params["bn3_scale"],
                           params["bn4_scale"]]).astype(jnp.float32)
    bias_all = jnp.stack([params["bn2_bias"], params["bn3_bias"],
                          params["bn4_bias"]]).astype(jnp.float32)
    b2, b3, b4 = fused_dilated_branches(
        x_big, w_all, scale_all, bias_all, rates=dil_rates, max_rate=max_rate,
        N=N, W=W, Wp=Wp, Hpad=Hpad, TH=TH, Cin=Cin, P=P)

    def _flat(b):
        b = b.reshape(N, Hpad * W, P)
        return b[:, :H * W, :] if Hpad != H else b
    x2, x3, x4 = _flat(b2), _flat(b3), _flat(b4)

    # branch 5: GAP directly from NCHW (no extra full-size pass) -> tiny matmul
    pooled = jnp.mean(x_nchw.astype(jnp.float32), axis=(2, 3))       # (N, Cin)
    x5 = matmul_bn_relu(pooled.astype(jnp.bfloat16),
                        params["w_gap"].astype(jnp.bfloat16),
                        params["bn_gap_scale"], params["bn_gap_bias"])
    x5 = x5.reshape(N, 1, P)

    # fused final projection: no concat / no broadcast materialized, bf16 out
    w_cat = params["w_cat"].reshape(5, P, P).astype(jnp.bfloat16)
    out = fused_final_projection(x1, x2, x3, x4, x5, w_cat,
                                 params["bn_cat_scale"],
                                 params["bn_cat_bias"])
    out = out.reshape(N, H, W, P)
    # NHWC -> NCHW in bf16; the f32 cast fuses into the transpose.
    return jnp.transpose(out, (0, 3, 1, 2)).astype(jnp.float32)


# ----------------------------------------------------------------------------
# Pure-JAX reference (lax convolutions) mirroring the bf16 storage points
# ----------------------------------------------------------------------------
def _ref_conv_bn_relu(x_b, w_hwio, scale, bias, rate, pad):
    y = jax.lax.conv_general_dilated(
        x_b, w_hwio.astype(jnp.bfloat16), (1, 1), ((pad, pad), (pad, pad)),
        rhs_dilation=(rate, rate),
        dimension_numbers=("NHWC", "HWIO", "NHWC"),
        preferred_element_type=jnp.float32)
    return jnp.maximum(y * scale + bias, 0.0)


def aspp_reference(x_nchw, params):
    xf = jnp.transpose(x_nchw, (0, 2, 3, 1)).astype(jnp.float32)
    xb = xf.astype(jnp.bfloat16)
    N, H, W, Cin = xf.shape
    rates = params["rates"]
    P = params["w_aspp1"].shape[1]

    x1 = _ref_conv_bn_relu(xb, params["w_aspp1"].reshape(1, 1, Cin, P),
                           params["bn1_scale"], params["bn1_bias"], 1, 0)
    branches = [x1.astype(jnp.bfloat16)]
    for i, r in zip((2, 3, 4), rates[1:]):
        w = params[f"w_aspp{i}"].reshape(3, 3, Cin, P)
        branches.append(_ref_conv_bn_relu(
            xb, w, params[f"bn{i}_scale"], params[f"bn{i}_bias"],
            r, r).astype(jnp.bfloat16))
    pooled = jnp.mean(xf, axis=(1, 2), keepdims=True)                # (N,1,1,Cin)
    x5 = _ref_conv_bn_relu(pooled.astype(jnp.bfloat16),
                           params["w_gap"].reshape(1, 1, Cin, P),
                           params["bn_gap_scale"], params["bn_gap_bias"],
                           1, 0).astype(jnp.bfloat16)
    branches.append(jnp.broadcast_to(x5, (N, H, W, P)))
    cat = jnp.concatenate(branches, axis=-1)
    out = _ref_conv_bn_relu(cat, params["w_cat"].reshape(1, 1, 5 * P, P),
                            params["bn_cat_scale"], params["bn_cat_bias"], 1, 0)
    return jnp.transpose(out, (0, 3, 1, 2))


def _norm_err(a, b):
    a = a.astype(jnp.float32)
    b = b.astype(jnp.float32)
    return float(jnp.max(jnp.abs(a - b) / (1.0 + jnp.abs(b))))


# ----------------------------------------------------------------------------
if __name__ == "__main__":
    INPLANES, PLANES = 4, 8
    key = jax.random.PRNGKey(0)
    kx, kp = jax.random.split(key)
    params = make_aspp_params(kp, INPLANES, PLANES)

    # Test A: batch=2, default TH (whole 16-row image fits one halo slab).
    x = jax.random.normal(kx, (2, INPLANES, 16, 16), jnp.float32)     # NCHW
    out = jax.block_until_ready(aspp_forward(x, params))
    assert out.shape == (2, PLANES, 16, 16), out.shape
    ref = jax.block_until_ready(aspp_reference(x, params))
    err = _norm_err(out, ref)
    assert err < 2e-2, f"test A mismatch vs reference: {err}"

    # Test B: batch=1 with a small forced row tile -> exercises the
    # double-buffered slab prefetch chain and the 2-way core-split grid axis.
    x1b = x[:1]
    out_b = jax.block_until_ready(aspp_forward(x1b, params, th_override=4))
    ref_b = jax.block_until_ready(aspp_reference(x1b, params))
    err_b = _norm_err(out_b, ref_b)
    assert err_b < 2e-2, f"test B mismatch vs reference: {err_b}"

    print("KERNEL_OK")
</pallas_src>

<mosaic_0001>
module attributes {stable_mosaic.version = 11 : i64} {
  func.func @_matmul_bn_relu_kernel(%arg0: i32, %arg1: memref<512x4xbf16, #tpu.memory_space<vmem>>, %arg2: memref<4x8xbf16, #tpu.memory_space<vmem>>, %arg3: memref<1x8xf32, #tpu.memory_space<vmem>>, %arg4: memref<1x8xf32, #tpu.memory_space<vmem>>, %arg5: memref<512x8xbf16, #tpu.memory_space<vmem>>) attributes {dimension_semantics = [#tpu.dimension_semantics<parallel>], iteration_bounds = array<i64: 1>, scalar_prefetch = 0 : i64, scratch_operands = 0 : i64, tpu.core_type = #tpu.core_type<tc>, window_params = [{transform_indices = @transform_0, window_bounds = array<i64: 512, 4>}, {pipeline_mode = #tpu.pipeline_mode<synchronous>, transform_indices = @transform_1, window_bounds = array<i64: 4, 8>}, {pipeline_mode = #tpu.pipeline_mode<synchronous>, transform_indices = @transform_2, window_bounds = array<i64: 1, 8>}, {pipeline_mode = #tpu.pipeline_mode<synchronous>, transform_indices = @transform_3, window_bounds = array<i64: 1, 8>}, {transform_indices = @transform_4, window_bounds = array<i64: 512, 8>}]} {
    %c0 = arith.constant 0 : index
    %c0_0 = arith.constant 0 : index
    %0 = vector.load %arg1[%c0, %c0_0] : memref<512x4xbf16, #tpu.memory_space<vmem>>, vector<512x4xbf16>
    %c0_1 = arith.constant 0 : index
    %c0_2 = arith.constant 0 : index
    %1 = vector.load %arg2[%c0_1, %c0_2] : memref<4x8xbf16, #tpu.memory_space<vmem>>, vector<4x8xbf16>
    %cst = arith.constant dense<0.000000e+00> : vector<512x8xf32>
    %2 = tpu.matmul %0, %1, %cst {dimension_numbers = #tpu.dot_dimension_numbers<[1], [0], [0], [1], [0, 0, 1, 1], [], []>} : vector<512x4xbf16>, vector<4x8xbf16>, vector<512x8xf32> -> vector<512x8xf32>
    %c0_3 = arith.constant 0 : index
    %c0_4 = arith.constant 0 : index
    %3 = vector.load %arg3[%c0_3, %c0_4] : memref<1x8xf32, #tpu.memory_space<vmem>>, vector<1x8xf32>
    %4 = vector.broadcast %3 : vector<1x8xf32> to vector<512x8xf32>
    %5 = arith.mulf %2, %4 : vector<512x8xf32>
    %c0_5 = arith.constant 0 : index
    %c0_6 = arith.constant 0 : index
    %6 = vector.load %arg4[%c0_5, %c0_6] : memref<1x8xf32, #tpu.memory_space<vmem>>, vector<1x8xf32>
    %7 = vector.broadcast %6 : vector<1x8xf32> to vector<512x8xf32>
    %8 = arith.addf %5, %7 : vector<512x8xf32>
    %cst_7 = arith.constant 0.000000e+00 : f32
    %9 = vector.broadcast %cst_7 : f32 to vector<512x8xf32>
    %10 = arith.maximumf %8, %9 : vector<512x8xf32>
    %11 = arith.truncf %10 : vector<512x8xf32> to vector<512x8xbf16>
    %c0_8 = arith.constant 0 : index
    %c0_9 = arith.constant 0 : index
    %12 = vector.load %arg5[%c0_8, %c0_9] : memref<512x8xbf16, #tpu.memory_space<vmem>>, vector<512x8xbf16>
    tpu.vector_store %arg5[%c0_8, %c0_9], %11 {strides = array<i32>} : memref<512x8xbf16, #tpu.memory_space<vmem>>, vector<512x8xbf16>,
    return
  }
  func.func @transform_0(%arg0: i32) -> (i32, i32) {
    %c0_i32 = arith.constant 0 : i32
    %c0_i32_0 = arith.constant 0 : i32
    return %arg0, %c0_i32 : i32, i32
  }
  func.func @transform_1(%arg0: i32) -> (i32, i32) {
    %c0_i32 = arith.constant 0 : i32
    %c0_i32_0 = arith.constant 0 : i32
    %c0_i32_1 = arith.constant 0 : i32
    return %c0_i32, %c0_i32_0 : i32, i32
  }
  func.func @transform_2(%arg0: i32) -> (i32, i32) {
    %c0_i32 = arith.constant 0 : i32
    %c0_i32_0 = arith.constant 0 : i32
    %c0_i32_1 = arith.constant 0 : i32
    return %c0_i32, %c0_i32_0 : i32, i32
  }
  func.func @transform_3(%arg0: i32) -> (i32, i32) {
    %c0_i32 = arith.constant 0 : i32
    %c0_i32_0 = arith.constant 0 : i32
    %c0_i32_1 = arith.constant 0 : i32
    return %c0_i32, %c0_i32_0 : i32, i32
  }
  func.func @transform_4(%arg0: i32) -> (i32, i32) {
    %c0_i32 = arith.constant 0 : i32
    %c0_i32_0 = arith.constant 0 : i32
    return %arg0, %c0_i32 : i32, i32
  }
}

</mosaic_0001>

<bundles_post_ra>
// kernel: tpu_custom_call.1
= control target key start
LH: loop header
LB: loop body
LE: loop exit
PB: predicated region body
PF: predicated region fallthrough
CT: control target
= control target key end

     0   :  { %vm340_vm0 = vcmask 1041408   ;;  %vm243_vm1 = vcmask 31744   ;;  %vm777_vm2 = vcmask 60416   ;;  %s1593_s1 = inlined_call_operand.vmem [shape: bf16[4,8], index: 1, kind: input, shape index: {}]   ;;  %s1594_s0 = inlined_call_operand.vmem [shape: bf16[512,4], index: 0, kind: input, shape index: {}]   ;;  %s1595_s2 = inlined_call_operand.vmem [shape: f32[1,8], index: 2, kind: input, shape index: {}]   ;;  %s1596_s3 = inlined_call_operand.vmem [shape: f32[1,8], index: 3, kind: input, shape index: {}]   ;;  %s1597_s4 = inlined_call_operand.vmem [shape: bf16[512,8], index: 4, kind: output, shape index: {}]  }
   0x1   :  { %v82_v0 = vld [vmem:[%s1593_s1] sm:$0x3]  ;;  %v1007_v6 = vld [vmem:[%s1594_s0 + $0x8] sm:$0xff]  ;;  %v1008_v10 = vld [vmem:[%s1594_s0 + $0x10] sm:$0xff] }
   0x2   :  { %v342_v1 = vsel %vm340_vm0, %v82_v0, 0  ;;  %v1006_v2 = vld [vmem:[%s1594_s0] sm:$0xff]  ;;  %v1015_v7 = vld [vmem:[%s1594_s0 + $0x48] sm:$0xff]  ;;  %v1016_v11 = vld [vmem:[%s1594_s0 + $0x50] sm:$0xff] }
   0x3   :  { %v1014_v3 = vld [vmem:[%s1594_s0 + $0x40] sm:$0xff]  ;;  %351 = vmatpush.bf16.msra.mxu0 %v342_v1  ;;  %1038 = vmatpush.bf16.msra.mxu1 %v342_v1  ;;  %v1023_v8 = vld [vmem:[%s1594_s0 + $0x88] sm:$0xff]  ;;  %v1024_v12 = vld [vmem:[%s1594_s0 + $0x90] sm:$0xff] }
   0x4   :  { %v1022_v4 = vld [vmem:[%s1594_s0 + $0x80] sm:$0xff]  ;;  %1039 = vmatpush.bf16.msra.mxu2 %v342_v1  ;;  %1040 = vmatpush.bf16.msra.mxu3 %v342_v1  ;;  %v1031_v9 = vld [vmem:[%s1594_s0 + $0xc8] sm:$0xff]  ;;  %v1032_v13 = vld [vmem:[%s1594_s0 + $0xd0] sm:$0xff] }
   0x5   :  { %v1030_v5 = vld [vmem:[%s1594_s0 + $0xc0] sm:$0xff]  ;;  %v1009_v14 = vld [vmem:[%s1594_s0 + $0x18] sm:$0xff]  ;;  %v1011_v22 = vld [vmem:[%s1594_s0 + $0x28] sm:$0xff] }
   0x6   :  { %974 = vmatmul.msk.bf16.vlgmr.msra.gmra.mxu0 %vm243_vm1, %v1006_v2  ;;  %982 = vmatmul.msk.bf16.vlgmr.msra.gmra.mxu1 %vm243_vm1, %v1014_v3  ;;  %v1017_v15 = vld [vmem:[%s1594_s0 + $0x58] sm:$0xff]  ;;  %v1010_v18 = vld [vmem:[%s1594_s0 + $0x20] sm:$0xff]  ;;  %v1019_v23 = vld [vmem:[%s1594_s0 + $0x68] sm:$0xff] }
   0x7   :  { %990 = vmatmul.msk.bf16.vlgmr.msra.gmra.mxu2 %vm243_vm1, %v1022_v4  ;;  %998 = vmatmul.msk.bf16.vlgmr.msra.gmra.mxu3 %vm243_vm1, %v1030_v5  ;;  %v1025_v16 = vld [vmem:[%s1594_s0 + $0x98] sm:$0xff]  ;;  %v1018_v19 = vld [vmem:[%s1594_s0 + $0x60] sm:$0xff]  ;;  %v1027_v24 = vld [vmem:[%s1594_s0 + $0xa8] sm:$0xff] }
   0x8   :  { %v1033_v17 = vld [vmem:[%s1594_s0 + $0xd8] sm:$0xff]  ;;  %v1026_v20 = vld [vmem:[%s1594_s0 + $0xa0] sm:$0xff]  ;;  %v1035_v25 = vld [vmem:[%s1594_s0 + $0xe8] sm:$0xff] }
   0x9   :  { %v1034_v21 = vld [vmem:[%s1594_s0 + $0xe0] sm:$0xff]  ;;  %v1012_v26 = vld [vmem:[%s1594_s0 + $0x30] sm:$0xff]  ;;  %v1013_v30 = vld [vmem:[%s1594_s0 + $0x38] sm:$0xff] }
   0xa   :  { %v1020_v27 = vld [vmem:[%s1594_s0 + $0x70] sm:$0xff]  ;;  %v1021_v31 = vld [vmem:[%s1594_s0 + $0x78] sm:$0xff]  ;;  %v1202_v34 = vld [vmem:[%s1595_s2] ss:$0 sm:$0xff] }
   0xb   :  { %v1028_v28 = vld [vmem:[%s1594_s0 + $0xb0] sm:$0xff]  ;;  %v1029_v32 = vld [vmem:[%s1594_s0 + $0xb8] sm:$0xff]  ;;  %v1207_v35 = vld [vmem:[%s1596_s3] ss:$0 sm:$0xff] }
   0xc   :  { %v1036_v29 = vld [vmem:[%s1594_s0 + $0xf0] sm:$0xff]  ;;  %v1037_v33 = vld [vmem:[%s1594_s0 + $0xf8] sm:$0xff] }
  0x16   :  { %975 = vmatmul.msk.bf16.gmra.mxu0 %vm243_vm1, %v1007_v6  ;;  %983 = vmatmul.msk.bf16.gmra.mxu1 %vm243_vm1, %v1015_v7 }
  0x17   :  { %991 = vmatmul.msk.bf16.gmra.mxu2 %vm243_vm1, %v1023_v8  ;;  %999 = vmatmul.msk.bf16.gmra.mxu3 %vm243_vm1, %v1031_v9 }
  0x26   :  { %976 = vmatmul.msk.bf16.gmra.mxu0 %vm243_vm1, %v1008_v10  ;;  %984 = vmatmul.msk.bf16.gmra.mxu1 %vm243_vm1, %v1016_v11 }
  0x27   :  { %992 = vmatmul.msk.bf16.gmra.mxu2 %vm243_vm1, %v1024_v12  ;;  %1000 = vmatmul.msk.bf16.gmra.mxu3 %vm243_vm1, %v1032_v13 }
  0x36   :  { %977 = vmatmul.msk.bf16.gmra.mxu0 %vm243_vm1, %v1009_v14  ;;  %985 = vmatmul.msk.bf16.gmra.mxu1 %vm243_vm1, %v1017_v15 }
  0x37   :  { %993 = vmatmul.msk.bf16.gmra.mxu2 %vm243_vm1, %v1025_v16  ;;  %1001 = vmatmul.msk.bf16.gmra.mxu3 %vm243_vm1, %v1033_v17 }
  0x46   :  { %978 = vmatmul.msk.bf16.gmra.mxu0 %vm243_vm1, %v1010_v18  ;;  %986 = vmatmul.msk.bf16.gmra.mxu1 %vm243_vm1, %v1018_v19 }
  0x47   :  { %994 = vmatmul.msk.bf16.gmra.mxu2 %vm243_vm1, %v1026_v20  ;;  %1002 = vmatmul.msk.bf16.gmra.mxu3 %vm243_vm1, %v1034_v21 }
  0x56   :  { %979 = vmatmul.msk.bf16.gmra.mxu0 %vm243_vm1, %v1011_v22  ;;  %987 = vmatmul.msk.bf16.gmra.mxu1 %vm243_vm1, %v1019_v23 }
  0x57   :  { %995 = vmatmul.msk.bf16.gmra.mxu2 %vm243_vm1, %v1027_v24  ;;  %1003 = vmatmul.msk.bf16.gmra.mxu3 %vm243_vm1, %v1035_v25 }
  0x66   :  { %980 = vmatmul.msk.bf16.gmra.mxu0 %vm243_vm1, %v1012_v26  ;;  %988 = vmatmul.msk.bf16.gmra.mxu1 %vm243_vm1, %v1020_v27 }
  0x67   :  { %996 = vmatmul.msk.bf16.gmra.mxu2 %vm243_vm1, %v1028_v28  ;;  %1004 = vmatmul.msk.bf16.gmra.mxu3 %vm243_vm1, %v1036_v29 }
  0x76   :  { %981 = vmatmul.msk.bf16.gmra.mxu0 %vm243_vm1, %v1013_v30  ;;  %989 = vmatmul.msk.bf16.gmra.mxu1 %vm243_vm1, %v1021_v31 }
  0x77   :  { %997 = vmatmul.msk.bf16.gmra.mxu2 %vm243_vm1, %v1029_v32  ;;  %1005 = vmatmul.msk.bf16.gmra.mxu3 %vm243_vm1, %v1037_v33 }
  0x83   :  { %v353_v36 = vpop.f32.mrf.mxu0  ;;  %v393_v37 = vpop.f32.mrf.mxu1 }
  0x84   :  { %v517_v38 = vmul.f32 %v1202_v34, %v353_v36  ;;  %v533_v39 = vmul.f32 %v1202_v34, %v393_v37 }
  0x86   :  { %v585_v40 = vadd.f32 %v1207_v35, %v517_v38  ;;  %v601_v41 = vadd.f32 %v1207_v35, %v533_v39 }
  0x88   :  { %v649_v42 = vmax.f32 %v585_v40, 0.0  ;;  %v665_v43 = vmax.f32 %v601_v41, 0.0 }
  0x8a   :  { %v713_v44 = vpack.c.bf16 %v649_v42, %v649_v42  ;;  %v729_v45 = vpack.c.bf16 %v665_v43, %v665_v43  ;;  %v433_v46 = vpop.f32.mrf.mxu2  ;;  %v473_v47 = vpop.f32.mrf.mxu3 }
  0x8b   :  { %v549_v48 = vmul.f32 %v1202_v34, %v433_v46  ;;  %v565_v49 = vmul.f32 %v1202_v34, %v473_v47  ;;  %v355_v50 = vpop.f32.mrf.mxu0  ;;  %v395_v51 = vpop.f32.mrf.mxu1 }
  0x8c   :  { %778 = vst.msk [vmem:[%s1597_s4] sm:$0xf] %vm777_vm2, %v713_v44  ;;  %v518_v52 = vmul.f32 %v1202_v34, %v355_v50  ;;  %v534_v53 = vmul.f32 %v1202_v34, %v395_v51 }
  0x8d   :  { %794 = vst.msk [vmem:[%s1597_s4 + $0x40] sm:$0xf] %vm777_vm2, %v729_v45  ;;  %v617_v54 = vadd.f32 %v1207_v35, %v549_v48  ;;  %v633_v55 = vadd.f32 %v1207_v35, %v565_v49 }
  0x8e   :  { %v586_v56 = vadd.f32 %v1207_v35, %v518_v52  ;;  %v602_v57 = vadd.f32 %v1207_v35, %v534_v53 }
  0x8f   :  { %v681_v58 = vmax.f32 %v617_v54, 0.0  ;;  %v697_v59 = vmax.f32 %v633_v55, 0.0 }
  0x90   :  { %v650_v60 = vmax.f32 %v586_v56, 0.0  ;;  %v666_v61 = vmax.f32 %v602_v57, 0.0 }
  0x91   :  { %v745_v62 = vpack.c.bf16 %v681_v58, %v681_v58  ;;  %v761_v63 = vpack.c.bf16 %v697_v59, %v697_v59 }
  0x92   :  { %v714_v0 = vpack.c.bf16 %v650_v60, %v650_v60  ;;  %v730_v1 = vpack.c.bf16 %v666_v61, %v666_v61  ;;  %v435_v2 = vpop.f32.mrf.mxu2  ;;  %v475_v3 = vpop.f32.mrf.mxu3 }
  0x93   :  { %810 = vst.msk [vmem:[%s1597_s4 + $0x80] sm:$0xf] %vm777_vm2, %v745_v62  ;;  %v550_v4 = vmul.f32 %v1202_v34, %v435_v2  ;;  %v566_v5 = vmul.f32 %v1202_v34, %v475_v3  ;;  %v358_v6 = vpop.f32.mrf.mxu0  ;;  %v398_v7 = vpop.f32.mrf.mxu1 }
  0x94   :  { %826 = vst.msk [vmem:[%s1597_s4 + $0xc0] sm:$0xf] %vm777_vm2, %v761_v63  ;;  %v519_v8 = vmul.f32 %v1202_v34, %v358_v6  ;;  %v535_v9 = vmul.f32 %v1202_v34, %v398_v7 }
  0x95   :  { %779 = vst.msk [vmem:[%s1597_s4 + $0x4] sm:$0xf] %vm777_vm2, %v714_v0  ;;  %v618_v10 = vadd.f32 %v1207_v35, %v550_v4  ;;  %v634_v11 = vadd.f32 %v1207_v35, %v566_v5 }
  0x96   :  { %795 = vst.msk [vmem:[%s1597_s4 + $0x44] sm:$0xf] %vm777_vm2, %v730_v1  ;;  %v587_v12 = vadd.f32 %v1207_v35, %v519_v8  ;;  %v603_v13 = vadd.f32 %v1207_v35, %v535_v9 }
  0x97   :  { %v682_v14 = vmax.f32 %v618_v10, 0.0  ;;  %v698_v15 = vmax.f32 %v634_v11, 0.0 }
  0x98   :  { %v651_v16 = vmax.f32 %v587_v12, 0.0  ;;  %v667_v17 = vmax.f32 %v603_v13, 0.0 }
  0x99   :  { %v746_v18 = vpack.c.bf16 %v682_v14, %v682_v14  ;;  %v762_v19 = vpack.c.bf16 %v698_v15, %v698_v15 }
  0x9a   :  { %v715_v20 = vpack.c.bf16 %v651_v16, %v651_v16  ;;  %v731_v21 = vpack.c.bf16 %v667_v17, %v667_v17  ;;  %v438_v22 = vpop.f32.mrf.mxu2  ;;  %v478_v23 = vpop.f32.mrf.mxu3 }
  0x9b   :  { %811 = vst.msk [vmem:[%s1597_s4 + $0x84] sm:$0xf] %vm777_vm2, %v746_v18  ;;  %v551_v24 = vmul.f32 %v1202_v34, %v438_v22  ;;  %v567_v25 = vmul.f32 %v1202_v34, %v478_v23  ;;  %v360_v26 = vpop.f32.mrf.mxu0  ;;  %v400_v27 = vpop.f32.mrf.mxu1 }
  0x9c   :  { %827 = vst.msk [vmem:[%s1597_s4 + $0xc4] sm:$0xf] %vm777_vm2, %v762_v19  ;;  %v520_v28 = vmul.f32 %v1202_v34, %v360_v26  ;;  %v536_v29 = vmul.f32 %v1202_v34, %v400_v27 }
  0x9d   :  { %780 = vst.msk [vmem:[%s1597_s4 + $0x8] sm:$0xf] %vm777_vm2, %v715_v20  ;;  %v619_v30 = vadd.f32 %v1207_v35, %v551_v24  ;;  %v635_v31 = vadd.f32 %v1207_v35, %v567_v25 }
  0x9e   :  { %796 = vst.msk [vmem:[%s1597_s4 + $0x48] sm:$0xf] %vm777_vm2, %v731_v21  ;;  %v588_v32 = vadd.f32 %v1207_v35, %v520_v28  ;;  %v604_v33 = vadd.f32 %v1207_v35, %v536_v29 }
  0x9f   :  { %v683_v36 = vmax.f32 %v619_v30, 0.0  ;;  %v699_v37 = vmax.f32 %v635_v31, 0.0 }
  0xa0   :  { %v652_v38 = vmax.f32 %v588_v32, 0.0  ;;  %v668_v39 = vmax.f32 %v604_v33, 0.0 }
  0xa1   :  { %v747_v40 = vpack.c.bf16 %v683_v36, %v683_v36  ;;  %v763_v41 = vpack.c.bf16 %v699_v37, %v699_v37 }
  0xa2   :  { %v716_v42 = vpack.c.bf16 %v652_v38, %v652_v38  ;;  %v732_v43 = vpack.c.bf16 %v668_v39, %v668_v39  ;;  %v440_v44 = vpop.f32.mrf.mxu2  ;;  %v480_v45 = vpop.f32.mrf.mxu3 }
  0xa3   :  { %812 = vst.msk [vmem:[%s1597_s4 + $0x88] sm:$0xf] %vm777_vm2, %v747_v40  ;;  %v552_v46 = vmul.f32 %v1202_v34, %v440_v44  ;;  %v568_v47 = vmul.f32 %v1202_v34, %v480_v45  ;;  %v363_v48 = vpop.f32.mrf.mxu0  ;;  %v403_v49 = vpop.f32.mrf.mxu1 }
  0xa4   :  { %828 = vst.msk [vmem:[%s1597_s4 + $0xc8] sm:$0xf] %vm777_vm2, %v763_v41  ;;  %v521_v50 = vmul.f32 %v1202_v34, %v363_v48  ;;  %v537_v51 = vmul.f32 %v1202_v34, %v403_v49 }
  0xa5   :  { %781 = vst.msk [vmem:[%s1597_s4 + $0xc] sm:$0xf] %vm777_vm2, %v716_v42  ;;  %v620_v52 = vadd.f32 %v1207_v35, %v552_v46  ;;  %v636_v53 = vadd.f32 %v1207_v35, %v568_v47 }
  0xa6   :  { %797 = vst.msk [vmem:[%s1597_s4 + $0x4c] sm:$0xf] %vm777_vm2, %v732_v43  ;;  %v589_v54 = vadd.f32 %v1207_v35, %v521_v50  ;;  %v605_v55 = vadd.f32 %v1207_v35, %v537_v51 }
  0xa7   :  { %v684_v56 = vmax.f32 %v620_v52, 0.0  ;;  %v700_v57 = vmax.f32 %v636_v53, 0.0 }
  0xa8   :  { %v653_v58 = vmax.f32 %v589_v54, 0.0  ;;  %v669_v59 = vmax.f32 %v605_v55, 0.0 }
  0xa9   :  { %v748_v60 = vpack.c.bf16 %v684_v56, %v684_v56  ;;  %v764_v61 = vpack.c.bf16 %v700_v57, %v700_v57 }
  0xaa   :  { %v717_v62 = vpack.c.bf16 %v653_v58, %v653_v58  ;;  %v733_v63 = vpack.c.bf16 %v669_v59, %v669_v59  ;;  %v443_v0 = vpop.f32.mrf.mxu2  ;;  %v483_v1 = vpop.f32.mrf.mxu3 }
  0xab   :  { %813 = vst.msk [vmem:[%s1597_s4 + $0x8c] sm:$0xf] %vm777_vm2, %v748_v60  ;;  %v553_v2 = vmul.f32 %v1202_v34, %v443_v0  ;;  %v569_v3 = vmul.f32 %v1202_v34, %v483_v1  ;;  %v365_v4 = vpop.f32.mrf.mxu0  ;;  %v405_v5 = vpop.f32.mrf.mxu1 }
  0xac   :  { %829 = vst.msk [vmem:[%s1597_s4 + $0xcc] sm:$0xf] %vm777_vm2, %v764_v61  ;;  %v522_v6 = vmul.f32 %v1202_v34, %v365_v4  ;;  %v538_v7 = vmul.f32 %v1202_v34, %v405_v5 }
  0xad   :  { %782 = vst.msk [vmem:[%s1597_s4 + $0x10] sm:$0xf] %vm777_vm2, %v717_v62  ;;  %v621_v8 = vadd.f32 %v1207_v35, %v553_v2  ;;  %v637_v9 = vadd.f32 %v1207_v35, %v569_v3 }
  0xae   :  { %798 = vst.msk [vmem:[%s1597_s4 + $0x50] sm:$0xf] %vm777_vm2, %v733_v63  ;;  %v590_v10 = vadd.f32 %v1207_v35, %v522_v6  ;;  %v606_v11 = vadd.f32 %v1207_v35, %v538_v7 }
  0xaf   :  { %v685_v12 = vmax.f32 %v621_v8, 0.0  ;;  %v701_v13 = vmax.f32 %v637_v9, 0.0 }
  0xb0   :  { %v654_v14 = vmax.f32 %v590_v10, 0.0  ;;  %v670_v15 = vmax.f32 %v606_v11, 0.0 }
  0xb1   :  { %v749_v16 = vpack.c.bf16 %v685_v12, %v685_v12  ;;  %v765_v17 = vpack.c.bf16 %v701_v13, %v701_v13 }
  0xb2   :  { %v718_v18 = vpack.c.bf16 %v654_v14, %v654_v14  ;;  %v734_v19 = vpack.c.bf16 %v670_v15, %v670_v15  ;;  %v445_v20 = vpop.f32.mrf.mxu2  ;;  %v485_v21 = vpop.f32.mrf.mxu3 }
  0xb3   :  { %814 = vst.msk [vmem:[%s1597_s4 + $0x90] sm:$0xf] %vm777_vm2, %v749_v16  ;;  %v554_v22 = vmul.f32 %v1202_v34, %v445_v20  ;;  %v570_v23 = vmul.f32 %v1202_v34, %v485_v21  ;;  %v368_v24 = vpop.f32.mrf.mxu0  ;;  %v408_v25 = vpop.f32.mrf.mxu1 }
  0xb4   :  { %830 = vst.msk [vmem:[%s1597_s4 + $0xd0] sm:$0xf] %vm777_vm2, %v765_v17  ;;  %v523_v26 = vmul.f32 %v1202_v34, %v368_v24  ;;  %v539_v27 = vmul.f32 %v1202_v34, %v408_v25 }
  0xb5   :  { %783 = vst.msk [vmem:[%s1597_s4 + $0x14] sm:$0xf] %vm777_vm2, %v718_v18  ;;  %v622_v28 = vadd.f32 %v1207_v35, %v554_v22  ;;  %v638_v29 = vadd.f32 %v1207_v35, %v570_v23 }
  0xb6   :  { %799 = vst.msk [vmem:[%s1597_s4 + $0x54] sm:$0xf] %vm777_vm2, %v734_v19  ;;  %v591_v30 = vadd.f32 %v1207_v35, %v523_v26  ;;  %v607_v31 = vadd.f32 %v1207_v35, %v539_v27 }
  0xb7   :  { %v686_v32 = vmax.f32 %v622_v28, 0.0  ;;  %v702_v33 = vmax.f32 %v638_v29, 0.0 }
  0xb8   :  { %v655_v36 = vmax.f32 %v591_v30, 0.0  ;;  %v671_v37 = vmax.f32 %v607_v31, 0.0 }
  0xb9   :  { %v750_v38 = vpack.c.bf16 %v686_v32, %v686_v32  ;;  %v766_v39 = vpack.c.bf16 %v702_v33, %v702_v33 }
  0xba   :  { %v719_v40 = vpack.c.bf16 %v655_v36, %v655_v36  ;;  %v735_v41 = vpack.c.bf16 %v671_v37, %v671_v37  ;;  %v448_v42 = vpop.f32.mrf.mxu2  ;;  %v488_v43 = vpop.f32.mrf.mxu3 }
  0xbb   :  { %815 = vst.msk [vmem:[%s1597_s4 + $0x94] sm:$0xf] %vm777_vm2, %v750_v38  ;;  %v555_v44 = vmul.f32 %v1202_v34, %v448_v42  ;;  %v571_v45 = vmul.f32 %v1202_v34, %v488_v43  ;;  %v370_v46 = vpop.f32.mrf.mxu0  ;;  %v410_v47 = vpop.f32.mrf.mxu1 }
  0xbc   :  { %831 = vst.msk [vmem:[%s1597_s4 + $0xd4] sm:$0xf] %vm777_vm2, %v766_v39  ;;  %v524_v48 = vmul.f32 %v1202_v34, %v370_v46  ;;  %v540_v49 = vmul.f32 %v1202_v34, %v410_v47 }
  0xbd   :  { %784 = vst.msk [vmem:[%s1597_s4 + $0x18] sm:$0xf] %vm777_vm2, %v719_v40  ;;  %v623_v50 = vadd.f32 %v1207_v35, %v555_v44  ;;  %v639_v51 = vadd.f32 %v1207_v35, %v571_v45 }
  0xbe   :  { %800 = vst.msk [vmem:[%s1597_s4 + $0x58] sm:$0xf] %vm777_vm2, %v735_v41  ;;  %v592_v52 = vadd.f32 %v1207_v35, %v524_v48  ;;  %v608_v53 = vadd.f32 %v1207_v35, %v540_v49 }
  0xbf   :  { %v687_v54 = vmax.f32 %v623_v50, 0.0  ;;  %v703_v55 = vmax.f32 %v639_v51, 0.0 }
  0xc0   :  { %v656_v56 = vmax.f32 %v592_v52, 0.0  ;;  %v672_v57 = vmax.f32 %v608_v53, 0.0 }
  0xc1   :  { %v751_v58 = vpack.c.bf16 %v687_v54, %v687_v54  ;;  %v767_v59 = vpack.c.bf16 %v703_v55, %v703_v55 }
  0xc2   :  { %v720_v60 = vpack.c.bf16 %v656_v56, %v656_v56  ;;  %v736_v61 = vpack.c.bf16 %v672_v57, %v672_v57  ;;  %v450_v62 = vpop.f32.mrf.mxu2  ;;  %v490_v63 = vpop.f32.mrf.mxu3 }
  0xc3   :  { %816 = vst.msk [vmem:[%s1597_s4 + $0x98] sm:$0xf] %vm777_vm2, %v751_v58  ;;  %v556_v0 = vmul.f32 %v1202_v34, %v450_v62  ;;  %v572_v1 = vmul.f32 %v1202_v34, %v490_v63  ;;  %v373_v2 = vpop.f32.mrf.mxu0  ;;  %v413_v3 = vpop.f32.mrf.mxu1 }
  0xc4   :  { %832 = vst.msk [vmem:[%s1597_s4 + $0xd8] sm:$0xf] %vm777_vm2, %v767_v59  ;;  %v525_v4 = vmul.f32 %v1202_v34, %v373_v2  ;;  %v541_v5 = vmul.f32 %v1202_v34, %v413_v3 }
  0xc5   :  { %785 = vst.msk [vmem:[%s1597_s4 + $0x1c] sm:$0xf] %vm777_vm2, %v720_v60  ;;  %v624_v6 = vadd.f32 %v1207_v35, %v556_v0  ;;  %v640_v7 = vadd.f32 %v1207_v35, %v572_v1 }
  0xc6   :  { %801 = vst.msk [vmem:[%s1597_s4 + $0x5c] sm:$0xf] %vm777_vm2, %v736_v61  ;;  %v593_v8 = vadd.f32 %v1207_v35, %v525_v4  ;;  %v609_v9 = vadd.f32 %v1207_v35, %v541_v5 }
  0xc7   :  { %v688_v10 = vmax.f32 %v624_v6, 0.0  ;;  %v704_v11 = vmax.f32 %v640_v7, 0.0 }
  0xc8   :  { %v657_v12 = vmax.f32 %v593_v8, 0.0  ;;  %v673_v13 = vmax.f32 %v609_v9, 0.0 }
  0xc9   :  { %v752_v14 = vpack.c.bf16 %v688_v10, %v688_v10  ;;  %v768_v15 = vpack.c.bf16 %v704_v11, %v704_v11 }
  0xca   :  { %v721_v16 = vpack.c.bf16 %v657_v12, %v657_v12  ;;  %v737_v17 = vpack.c.bf16 %v673_v13, %v673_v13  ;;  %v453_v18 = vpop.f32.mrf.mxu2  ;;  %v493_v19 = vpop.f32.mrf.mxu3 }
  0xcb   :  { %817 = vst.msk [vmem:[%s1597_s4 + $0x9c] sm:$0xf] %vm777_vm2, %v752_v14  ;;  %v557_v20 = vmul.f32 %v1202_v34, %v453_v18  ;;  %v573_v21 = vmul.f32 %v1202_v34, %v493_v19  ;;  %v375_v22 = vpop.f32.mrf.mxu0  ;;  %v415_v23 = vpop.f32.mrf.mxu1 }
  0xcc   :  { %833 = vst.msk [vmem:[%s1597_s4 + $0xdc] sm:$0xf] %vm777_vm2, %v768_v15  ;;  %v526_v24 = vmul.f32 %v1202_v34, %v375_v22  ;;  %v542_v25 = vmul.f32 %v1202_v34, %v415_v23 }
  0xcd   :  { %786 = vst.msk [vmem:[%s1597_s4 + $0x20] sm:$0xf] %vm777_vm2, %v721_v16  ;;  %v625_v26 = vadd.f32 %v1207_v35, %v557_v20  ;;  %v641_v27 = vadd.f32 %v1207_v35, %v573_v21 }
  0xce   :  { %802 = vst.msk [vmem:[%s1597_s4 + $0x60] sm:$0xf] %vm777_vm2, %v737_v17  ;;  %v594_v28 = vadd.f32 %v1207_v35, %v526_v24  ;;  %v610_v29 = vadd.f32 %v1207_v35, %v542_v25 }
  0xcf   :  { %v689_v30 = vmax.f32 %v625_v26, 0.0  ;;  %v705_v31 = vmax.f32 %v641_v27, 0.0 }
  0xd0   :  { %v658_v32 = vmax.f32 %v594_v28, 0.0  ;;  %v674_v33 = vmax.f32 %v610_v29, 0.0 }
  0xd1   :  { %v753_v36 = vpack.c.bf16 %v689_v30, %v689_v30  ;;  %v769_v37 = vpack.c.bf16 %v705_v31, %v705_v31 }
  0xd2   :  { %v722_v38 = vpack.c.bf16 %v658_v32, %v658_v32  ;;  %v738_v39 = vpack.c.bf16 %v674_v33, %v674_v33  ;;  %v455_v40 = vpop.f32.mrf.mxu2  ;;  %v495_v41 = vpop.f32.mrf.mxu3 }
  0xd3   :  { %818 = vst.msk [vmem:[%s1597_s4 + $0xa0] sm:$0xf] %vm777_vm2, %v753_v36  ;;  %v558_v42 = vmul.f32 %v1202_v34, %v455_v40  ;;  %v574_v43 = vmul.f32 %v1202_v34, %v495_v41  ;;  %v378_v44 = vpop.f32.mrf.mxu0  ;;  %v418_v45 = vpop.f32.mrf.mxu1 }
  0xd4   :  { %834 = vst.msk [vmem:[%s1597_s4 + $0xe0] sm:$0xf] %vm777_vm2, %v769_v37  ;;  %v527_v46 = vmul.f32 %v1202_v34, %v378_v44  ;;  %v543_v47 = vmul.f32 %v1202_v34, %v418_v45 }
  0xd5   :  { %787 = vst.msk [vmem:[%s1597_s4 + $0x24] sm:$0xf] %vm777_vm2, %v722_v38  ;;  %v626_v48 = vadd.f32 %v1207_v35, %v558_v42  ;;  %v642_v49 = vadd.f32 %v1207_v35, %v574_v43 }
  0xd6   :  { %803 = vst.msk [vmem:[%s1597_s4 + $0x64] sm:$0xf] %vm777_vm2, %v738_v39  ;;  %v595_v50 = vadd.f32 %v1207_v35, %v527_v46  ;;  %v611_v51 = vadd.f32 %v1207_v35, %v543_v47 }
  0xd7   :  { %v690_v52 = vmax.f32 %v626_v48, 0.0  ;;  %v706_v53 = vmax.f32 %v642_v49, 0.0 }
  0xd8   :  { %v659_v54 = vmax.f32 %v595_v50, 0.0  ;;  %v675_v55 = vmax.f32 %v611_v51, 0.0 }
  0xd9   :  { %v754_v56 = vpack.c.bf16 %v690_v52, %v690_v52  ;;  %v770_v57 = vpack.c.bf16 %v706_v53, %v706_v53 }
  0xda   :  { %v723_v58 = vpack.c.bf16 %v659_v54, %v659_v54  ;;  %v739_v59 = vpack.c.bf16 %v675_v55, %v675_v55  ;;  %v458_v60 = vpop.f32.mrf.mxu2  ;;  %v498_v61 = vpop.f32.mrf.mxu3 }
  0xdb   :  { %819 = vst.msk [vmem:[%s1597_s4 + $0xa4] sm:$0xf] %vm777_vm2, %v754_v56  ;;  %v559_v62 = vmul.f32 %v1202_v34, %v458_v60  ;;  %v575_v63 = vmul.f32 %v1202_v34, %v498_v61  ;;  %v380_v0 = vpop.f32.mrf.mxu0  ;;  %v420_v1 = vpop.f32.mrf.mxu1 }
  0xdc   :  { %835 = vst.msk [vmem:[%s1597_s4 + $0xe4] sm:$0xf] %vm777_vm2, %v770_v57  ;;  %v528_v2 = vmul.f32 %v1202_v34, %v380_v0  ;;  %v544_v3 = vmul.f32 %v1202_v34, %v420_v1 }
  0xdd   :  { %788 = vst.msk [vmem:[%s1597_s4 + $0x28] sm:$0xf] %vm777_vm2, %v723_v58  ;;  %v627_v4 = vadd.f32 %v1207_v35, %v559_v62  ;;  %v643_v5 = vadd.f32 %v1207_v35, %v575_v63 }
  0xde   :  { %804 = vst.msk [vmem:[%s1597_s4 + $0x68] sm:$0xf] %vm777_vm2, %v739_v59  ;;  %v596_v6 = vadd.f32 %v1207_v35, %v528_v2  ;;  %v612_v7 = vadd.f32 %v1207_v35, %v544_v3 }
  0xdf   :  { %v691_v8 = vmax.f32 %v627_v4, 0.0  ;;  %v707_v9 = vmax.f32 %v643_v5, 0.0 }
  0xe0   :  { %v660_v10 = vmax.f32 %v596_v6, 0.0  ;;  %v676_v11 = vmax.f32 %v612_v7, 0.0 }
  0xe1   :  { %v755_v12 = vpack.c.bf16 %v691_v8, %v691_v8  ;;  %v771_v13 = vpack.c.bf16 %v707_v9, %v707_v9 }
  0xe2   :  { %v724_v14 = vpack.c.bf16 %v660_v10, %v660_v10  ;;  %v740_v15 = vpack.c.bf16 %v676_v11, %v676_v11  ;;  %v460_v16 = vpop.f32.mrf.mxu2  ;;  %v500_v17 = vpop.f32.mrf.mxu3 }
  0xe3   :  { %820 = vst.msk [vmem:[%s1597_s4 + $0xa8] sm:$0xf] %vm777_vm2, %v755_v12  ;;  %v560_v18 = vmul.f32 %v1202_v34, %v460_v16  ;;  %v576_v19 = vmul.f32 %v1202_v34, %v500_v17  ;;  %v383_v20 = vpop.f32.mrf.mxu0  ;;  %v423_v21 = vpop.f32.mrf.mxu1 }
  0xe4   :  { %836 = vst.msk [vmem:[%s1597_s4 + $0xe8] sm:$0xf] %vm777_vm2, %v771_v13  ;;  %v529_v22 = vmul.f32 %v1202_v34, %v383_v20  ;;  %v545_v23 = vmul.f32 %v1202_v34, %v423_v21 }
  0xe5   :  { %789 = vst.msk [vmem:[%s1597_s4 + $0x2c] sm:$0xf] %vm777_vm2, %v724_v14  ;;  %v628_v24 = vadd.f32 %v1207_v35, %v560_v18  ;;  %v644_v25 = vadd.f32 %v1207_v35, %v576_v19 }
  0xe6   :  { %805 = vst.msk [vmem:[%s1597_s4 + $0x6c] sm:$0xf] %vm777_vm2, %v740_v15  ;;  %v597_v26 = vadd.f32 %v1207_v35, %v529_v22  ;;  %v613_v27 = vadd.f32 %v1207_v35, %v545_v23 }
  0xe7   :  { %v692_v28 = vmax.f32 %v628_v24, 0.0  ;;  %v708_v29 = vmax.f32 %v644_v25, 0.0 }
  0xe8   :  { %v661_v30 = vmax.f32 %v597_v26, 0.0  ;;  %v677_v31 = vmax.f32 %v613_v27, 0.0 }
  0xe9   :  { %v756_v32 = vpack.c.bf16 %v692_v28, %v692_v28  ;;  %v772_v33 = vpack.c.bf16 %v708_v29, %v708_v29 }
  0xea   :  { %v725_v36 = vpack.c.bf16 %v661_v30, %v661_v30  ;;  %v741_v37 = vpack.c.bf16 %v677_v31, %v677_v31  ;;  %v463_v38 = vpop.f32.mrf.mxu2  ;;  %v503_v39 = vpop.f32.mrf.mxu3 }
  0xeb   :  { %821 = vst.msk [vmem:[%s1597_s4 + $0xac] sm:$0xf] %vm777_vm2, %v756_v32  ;;  %v561_v40 = vmul.f32 %v1202_v34, %v463_v38  ;;  %v577_v41 = vmul.f32 %v1202_v34, %v503_v39  ;;  %v385_v42 = vpop.f32.mrf.mxu0  ;;  %v425_v43 = vpop.f32.mrf.mxu1 }
  0xec   :  { %837 = vst.msk [vmem:[%s1597_s4 + $0xec] sm:$0xf] %vm777_vm2, %v772_v33  ;;  %v530_v44 = vmul.f32 %v1202_v34, %v385_v42  ;;  %v546_v45 = vmul.f32 %v1202_v34, %v425_v43 }
  0xed   :  { %790 = vst.msk [vmem:[%s1597_s4 + $0x30] sm:$0xf] %vm777_vm2, %v725_v36  ;;  %v629_v46 = vadd.f32 %v1207_v35, %v561_v40  ;;  %v645_v47 = vadd.f32 %v1207_v35, %v577_v41 }
  0xee   :  { %806 = vst.msk [vmem:[%s1597_s4 + $0x70] sm:$0xf] %vm777_vm2, %v741_v37  ;;  %v598_v48 = vadd.f32 %v1207_v35, %v530_v44  ;;  %v614_v49 = vadd.f32 %v1207_v35, %v546_v45 }
  0xef   :  { %v693_v50 = vmax.f32 %v629_v46, 0.0  ;;  %v709_v51 = vmax.f32 %v645_v47, 0.0 }
  0xf0   :  { %v662_v52 = vmax.f32 %v598_v48, 0.0  ;;  %v678_v53 = vmax.f32 %v614_v49, 0.0 }
  0xf1   :  { %v757_v54 = vpack.c.bf16 %v693_v50, %v693_v50  ;;  %v773_v55 = vpack.c.bf16 %v709_v51, %v709_v51 }
  0xf2   :  { %v726_v56 = vpack.c.bf16 %v662_v52, %v662_v52  ;;  %v742_v57 = vpack.c.bf16 %v678_v53, %v678_v53  ;;  %v465_v58 = vpop.f32.mrf.mxu2  ;;  %v505_v59 = vpop.f32.mrf.mxu3 }
  0xf3   :  { %822 = vst.msk [vmem:[%s1597_s4 + $0xb0] sm:$0xf] %vm777_vm2, %v757_v54  ;;  %v562_v60 = vmul.f32 %v1202_v34, %v465_v58  ;;  %v578_v61 = vmul.f32 %v1202_v34, %v505_v59  ;;  %v388_v62 = vpop.f32.mrf.mxu0  ;;  %v428_v63 = vpop.f32.mrf.mxu1 }
  0xf4   :  { %838 = vst.msk [vmem:[%s1597_s4 + $0xf0] sm:$0xf] %vm777_vm2, %v773_v55  ;;  %v531_v0 = vmul.f32 %v1202_v34, %v388_v62  ;;  %v547_v1 = vmul.f32 %v1202_v34, %v428_v63 }
  0xf5   :  { %791 = vst.msk [vmem:[%s1597_s4 + $0x34] sm:$0xf] %vm777_vm2, %v726_v56  ;;  %v630_v2 = vadd.f32 %v1207_v35, %v562_v60  ;;  %v646_v3 = vadd.f32 %v1207_v35, %v578_v61 }
  0xf6   :  { %807 = vst.msk [vmem:[%s1597_s4 + $0x74] sm:$0xf] %vm777_vm2, %v742_v57  ;;  %v599_v4 = vadd.f32 %v1207_v35, %v531_v0  ;;  %v615_v5 = vadd.f32 %v1207_v35, %v547_v1 }
  0xf7   :  { %v694_v6 = vmax.f32 %v630_v2, 0.0  ;;  %v710_v7 = vmax.f32 %v646_v3, 0.0 }
  0xf8   :  { %v663_v8 = vmax.f32 %v599_v4, 0.0  ;;  %v679_v9 = vmax.f32 %v615_v5, 0.0 }
  0xf9   :  { %v758_v10 = vpack.c.bf16 %v694_v6, %v694_v6  ;;  %v774_v11 = vpack.c.bf16 %v710_v7, %v710_v7 }
  0xfa   :  { %v727_v12 = vpack.c.bf16 %v663_v8, %v663_v8  ;;  %v743_v13 = vpack.c.bf16 %v679_v9, %v679_v9  ;;  %v468_v14 = vpop.f32.mrf.mxu2  ;;  %v508_v15 = vpop.f32.mrf.mxu3 }
  0xfb   :  { %823 = vst.msk [vmem:[%s1597_s4 + $0xb4] sm:$0xf] %vm777_vm2, %v758_v10  ;;  %v563_v16 = vmul.f32 %v1202_v34, %v468_v14  ;;  %v579_v17 = vmul.f32 %v1202_v34, %v508_v15  ;;  %v390_v18 = vpop.f32.mrf.mxu0  ;;  %v430_v19 = vpop.f32.mrf.mxu1 }
  0xfc   :  { %839 = vst.msk [vmem:[%s1597_s4 + $0xf4] sm:$0xf] %vm777_vm2, %v774_v11  ;;  %v532_v20 = vmul.f32 %v1202_v34, %v390_v18  ;;  %v548_v21 = vmul.f32 %v1202_v34, %v430_v19 }
  0xfd   :  { %792 = vst.msk [vmem:[%s1597_s4 + $0x38] sm:$0xf] %vm777_vm2, %v727_v12  ;;  %v631_v22 = vadd.f32 %v1207_v35, %v563_v16  ;;  %v647_v23 = vadd.f32 %v1207_v35, %v579_v17 }
  0xfe   :  { %808 = vst.msk [vmem:[%s1597_s4 + $0x78] sm:$0xf] %vm777_vm2, %v743_v13  ;;  %v600_v24 = vadd.f32 %v1207_v35, %v532_v20  ;;  %v616_v25 = vadd.f32 %v1207_v35, %v548_v21 }
  0xff   :  { %v695_v26 = vmax.f32 %v631_v22, 0.0  ;;  %v711_v27 = vmax.f32 %v647_v23, 0.0 }
 0x100   :  { %v664_v28 = vmax.f32 %v600_v24, 0.0  ;;  %v680_v29 = vmax.f32 %v616_v25, 0.0 }
 0x101   :  { %v759_v30 = vpack.c.bf16 %v695_v26, %v695_v26  ;;  %v775_v31 = vpack.c.bf16 %v711_v27, %v711_v27 }
 0x102   :  { %v728_v32 = vpack.c.bf16 %v664_v28, %v664_v28  ;;  %v744_v33 = vpack.c.bf16 %v680_v29, %v680_v29  ;;  %v470_v36 = vpop.f32.mrf.mxu2  ;;  %v510_v37 = vpop.f32.mrf.mxu3 }
 0x103   :  { %824 = vst.msk [vmem:[%s1597_s4 + $0xb8] sm:$0xf] %vm777_vm2, %v759_v30  ;;  %v564_v38 = vmul.f32 %v1202_v34, %v470_v36  ;;  %v580_v39 = vmul.f32 %v1202_v34, %v510_v37 }
 0x104   :  { %840 = vst.msk [vmem:[%s1597_s4 + $0xf8] sm:$0xf] %vm777_vm2, %v775_v31 }
 0x105   :  { %793 = vst.msk [vmem:[%s1597_s4 + $0x3c] sm:$0xf] %vm777_vm2, %v728_v32  ;;  %v632_v40 = vadd.f32 %v1207_v35, %v564_v38  ;;  %v648_v41 = vadd.f32 %v1207_v35, %v580_v39 }
 0x106   :  { %809 = vst.msk [vmem:[%s1597_s4 + $0x7c] sm:$0xf] %vm777_vm2, %v744_v33 }
 0x107   :  { %v696_v34 = vmax.f32 %v632_v40, 0.0  ;;  %v712_v42 = vmax.f32 %v648_v41, 0.0 }
 0x109   :  { %v760_v43 = vpack.c.bf16 %v696_v34, %v696_v34  ;;  %v776_v44 = vpack.c.bf16 %v712_v42, %v712_v42 }
 0x10b   :  { %825 = vst.msk [vmem:[%s1597_s4 + $0xbc] sm:$0xf] %vm777_vm2, %v760_v43 }
 0x10c   :  { %841 = vst.msk [vmem:[%s1597_s4 + $0xfc] sm:$0xf] %vm777_vm2, %v776_v44 }

</bundles_post_ra>
